<compile_context>
chip_gen: v7x
topology: tpu7x:2x2x1
jax: 0.10.0
libtpu: 0.0.40
codegen_flags: <defaults>
</compile_context>

<pallas_src>
import jax
import jax.numpy as jnp
from jax import lax
from jax.experimental import pallas as pl
from jax.experimental.pallas import tpu as pltpu

BN_EPS = 1e-5
_NEG_BIG = -1e30  # bias for padded hidden columns: never wins the argmax


def em_ssl_sender_kernel(
    x_ref,    # [TB, Kp]          bf16 image tile, K = C*H*W (GAP folded into wv)
    wv_ref,   # [Kp, Fp]          bf16 vision stand-in weight with 1/(H*W) folded in
    bv_ref,   # [1,  Fp]          f32  vision stand-in bias
    w1_ref,   # [Fp, Hp]          f32  fc weight with eval-BN folded in
    b1_ref,   # [1,  Hp]          f32  fc bias with eval-BN folded in (-1e30 in pad cols)
    wo_ref,   # [Hp, Op]          f32  fc_out weight (no bias)
    out_ref,  # [TB, Op]          f32
    msg_ref,  # [TB, Hp]          f32
    vis_ref,  # [TB, Fp]          f32
):
    # ---- vision module: GAP + Linear stand-in, pooling fused into the matmul ----
    # TODO(synk): the real vision_module is a full ResNet50/DeiT/Inception backbone;
    # a GAP + Linear stand-in producing n_features is used here (the GAP-fused
    # weight layout assumes image-like C*HW, which fits VMEM for this stand-in).
    vision = (
        jnp.dot(x_ref[...], wv_ref[...], preferred_element_type=jnp.float32)
        + bv_ref[...]
    )                                                              # [TB, Fp] f32
    vis_ref[...] = vision

    # ---- self.fc: Linear + BatchNorm1d (eval), BN pre-folded into w1/b1 ---------
    fp = (
        jnp.dot(vision, w1_ref[...], preferred_element_type=jnp.float32)
        + b1_ref[...]
    )                                                              # [TB, Hp]

    # ---- gumbel_softmax_sample, inference path: one_hot(argmax) -----------------
    # TODO(synk): training-mode RelaxedOneHotCategorical (Gumbel) sampling is not
    # implemented; the deterministic eval path (argmax one-hot) is used, where
    # temperature has no effect (matches EGG's gumbel_softmax_sample).
    hid = fp.shape[-1]
    col = lax.broadcasted_iota(jnp.int32, fp.shape, 1)
    row_max = jnp.max(fp, axis=-1, keepdims=True)
    first_hit = jnp.min(                       # first-occurrence tie-break (argmax)
        jnp.where(fp == row_max, col, hid), axis=-1, keepdims=True
    )
    message = (col == first_hit).astype(jnp.float32)               # [TB, Hp]
    msg_ref[...] = message

    # ---- self.fc_out: Linear(hidden_dim, output_dim, bias=False) ----------------
    # (one-hot matmul is fine for small hidden_dim; a per-row gather of wo would be
    #  preferable only at vocab-scale hidden_dim)
    out_ref[...] = jnp.dot(
        message, wo_ref[...], preferred_element_type=jnp.float32
    )


def _round_up(n, m):
    return ((n + m - 1) // m) * m


def _vmem_budget():
    """Return (tile budget bytes, vmem_limit cap bytes) per chip generation."""
    cap = 64 << 20  # conservative default: v7x-class per-core VMEM
    try:
        info = pltpu.get_tpu_info()
        cap = int(getattr(info, "vmem_capacity_bytes", cap))
    except Exception:
        pass
    if cap >= (96 << 20):          # v5e / v6e: 128 MiB physical VMEM
        return 96 << 20, 110 << 20
    return 40 << 20, 52 << 20      # v7x-class: 64 MiB physical VMEM, leave headroom


def _pick_batch_tile(B, Kp, F_pad, Hd_pad, O_pad):
    """Largest batch tile (multiple of 8, <=1024) fitting the VMEM budget."""
    budget, limit_cap = _vmem_budget()
    # streamed per-row bytes: bf16 x tile + f32 out/msg/vis tiles
    bytes_per_row = 2 * Kp + 4 * (F_pad + Hd_pad + O_pad)
    # resident weights, single-buffered: bf16 fused vision weight + f32 fc/fc_out
    weight_bytes = (
        2 * Kp * F_pad
        + 4 * (F_pad * Hd_pad + Hd_pad * O_pad)
        + 4 * 8 * (F_pad + Hd_pad)
    )
    avail = max(budget - weight_bytes, 2 * 8 * bytes_per_row)
    tb = avail // (2 * bytes_per_row)            # x2: x/outputs are double-buffered
    tb = max(8, min(1024, (tb // 8) * 8))
    b8 = _round_up(B, 8)
    tb = min(tb, b8)
    # Keep >= 2 grid steps when the batch permits, so dimension_semantics=
    # ("parallel",) gives the second TensorCore work on v7x megacore.
    if b8 >= 16 and tb > b8 // 2:
        tb = max(8, ((b8 // 2) // 8) * 8)
    b_pad = _round_up(B, tb)
    est = weight_bytes + 2 * tb * bytes_per_row
    vmem_limit = int(min(max(est * 5 // 4, 32 << 20), limit_cap))
    return tb, b_pad, vmem_limit


def _fold_and_pad_params(params, C, HW):
    """Fold GAP scale + eval-mode BN into the linears, pad features to 128."""
    wv, bv, w1, b1, gamma, beta, rmean, rvar, wo = params
    F = wv.shape[1]
    Hd = w1.shape[1]
    O = wo.shape[1]
    F_pad, Hd_pad, O_pad = (_round_up(d, 128) for d in (F, Hd, O))
    K = C * HW
    Kp = _round_up(K, 128)

    # GAP fused into the vision weight: w_fold[c*HW + hw, f] = wv[c, f] / HW
    w_fold = jnp.broadcast_to(wv[:, None, :] / HW, (C, HW, F)).reshape(K, F)
    scale = gamma * lax.rsqrt(rvar + BN_EPS)         # [1, Hd]
    w1_f = w1 * scale                                # BN folded into fc weight
    b1_f = (b1 - rmean) * scale + beta               # BN folded into fc bias

    wv_p = jnp.zeros((Kp, F_pad), jnp.bfloat16).at[:K, :F].set(
        w_fold.astype(jnp.bfloat16))
    bv_p = jnp.zeros((1, F_pad), jnp.float32).at[:, :F].set(bv)
    w1_p = jnp.zeros((F_pad, Hd_pad), jnp.float32).at[:F, :Hd].set(w1_f)
    b1_p = jnp.full((1, Hd_pad), _NEG_BIG, jnp.float32).at[:, :Hd].set(b1_f)
    wo_p = jnp.zeros((Hd_pad, O_pad), jnp.float32).at[:Hd, :O].set(wo)
    return wv_p, bv_p, w1_p, b1_p, wo_p, (F, Hd, O, F_pad, Hd_pad, O_pad, K, Kp)


def em_ssl_sender_forward(x, params):
    """x: [B, C, H, W] float32 (NCHW). Returns (out, message, vision_output)."""
    B, C, H, W = x.shape
    HW = H * W

    wv_p, bv_p, w1_p, b1_p, wo_p, dims = _fold_and_pad_params(params, C, HW)
    F, Hd, O, F_pad, Hd_pad, O_pad, K, Kp = dims

    # x stream in bf16 (the kernel is HBM-bandwidth bound on this stream); the MXU
    # matmul accumulates in f32.
    x2d = x.reshape(B, K).astype(jnp.bfloat16)

    TB, B_pad, vmem_limit = _pick_batch_tile(B, Kp, F_pad, Hd_pad, O_pad)
    if B_pad != B or Kp != K:
        x2d = jnp.pad(x2d, ((0, B_pad - B), (0, Kp - K)))

    grid = (B_pad // TB,)
    resident = dict(pipeline_mode=pl.Buffered(1))   # grid-invariant weights: 1 buffer

    grid_spec = pltpu.PrefetchScalarGridSpec(
        num_scalar_prefetch=0,
        grid=grid,
        in_specs=[
            pl.BlockSpec((TB, Kp), lambda i: (i, 0)),                # streamed x tile
            pl.BlockSpec((Kp, F_pad), lambda i: (0, 0), **resident),
            pl.BlockSpec((1, F_pad), lambda i: (0, 0), **resident),
            pl.BlockSpec((F_pad, Hd_pad), lambda i: (0, 0), **resident),
            pl.BlockSpec((1, Hd_pad), lambda i: (0, 0), **resident),
            pl.BlockSpec((Hd_pad, O_pad), lambda i: (0, 0), **resident),
        ],
        out_specs=(
            pl.BlockSpec((TB, O_pad), lambda i: (i, 0)),
            pl.BlockSpec((TB, Hd_pad), lambda i: (i, 0)),
            pl.BlockSpec((TB, F_pad), lambda i: (i, 0)),
        ),
    )

    out, msg, vis = pl.pallas_call(
        em_ssl_sender_kernel,
        out_shape=(
            jax.ShapeDtypeStruct((B_pad, O_pad), jnp.float32),
            jax.ShapeDtypeStruct((B_pad, Hd_pad), jnp.float32),
            jax.ShapeDtypeStruct((B_pad, F_pad), jnp.float32),
        ),
        grid_spec=grid_spec,
        compiler_params=pltpu.CompilerParams(
            dimension_semantics=("parallel",),
            vmem_limit_bytes=vmem_limit,
        ),
    )(x2d, wv_p, bv_p, w1_p, b1_p, wo_p)

    if B_pad == B and F_pad == F and Hd_pad == Hd and O_pad == O:
        return out, msg, vis
    return out[:B, :O], msg[:B, :Hd], vis[:B, :F]


def make_params(key, C, F, Hd, O):
    ks = jax.random.split(key, 9)
    wv = 0.1 * jax.random.normal(ks[0], (C, F), jnp.float32)
    bv = 0.1 * jax.random.normal(ks[1], (1, F), jnp.float32)
    w1 = 0.1 * jax.random.normal(ks[2], (F, Hd), jnp.float32)
    b1 = 0.5 * jax.random.normal(ks[3], (1, Hd), jnp.float32)
    gamma = 1.0 + 0.1 * jax.random.normal(ks[4], (1, Hd), jnp.float32)
    beta = 0.1 * jax.random.normal(ks[5], (1, Hd), jnp.float32)
    rmean = 0.1 * jax.random.normal(ks[6], (1, Hd), jnp.float32)
    rvar = 1.0 + 0.1 * jnp.abs(jax.random.normal(ks[7], (1, Hd), jnp.float32))
    wo = 0.1 * jax.random.normal(ks[8], (Hd, O), jnp.float32)
    return (wv, bv, w1, b1, gamma, beta, rmean, rvar, wo)


def reference_forward(x, params):
    """Pure-JAX f32 reference mirroring the PyTorch eval-mode forward (unfolded BN)."""
    wv, bv, w1, b1, gamma, beta, rmean, rvar, wo = params
    pooled = jnp.mean(x.reshape(x.shape[0], x.shape[1], -1), axis=-1)
    vision = pooled @ wv + bv
    h = vision @ w1 + b1
    fp = (h - rmean) / jnp.sqrt(rvar + BN_EPS) * gamma + beta
    msg = jax.nn.one_hot(jnp.argmax(fp, axis=-1), fp.shape[-1], dtype=jnp.float32)
    out = msg @ wo
    return out, msg, vision


if __name__ == "__main__":
    # small shapes: batch=2, channels=4, spatial=16x16, n_features=32,
    # hidden_dim=32, output_dim=32
    B, C, H, W = 2, 4, 16, 16
    F, Hd, O = 32, 32, 32

    key = jax.random.PRNGKey(0)
    k_x, k_p = jax.random.split(key)
    x = jax.random.normal(k_x, (B, C, H, W), jnp.float32)
    params = make_params(k_p, C, F, Hd, O)

    out, msg, vis = em_ssl_sender_forward(x, params)
    jax.block_until_ready((out, msg, vis))

    r_out, r_msg, r_vis = reference_forward(x, params)
    # vision output goes through the bf16 x stream -> loosened tolerance;
    # message (argmax one-hot) and out remain effectively exact.
    assert jnp.allclose(vis, r_vis, atol=5e-3, rtol=1e-2)
    assert jnp.allclose(msg, r_msg, atol=1e-6)
    assert jnp.allclose(out, r_out, atol=1e-5, rtol=1e-5)

    print("KERNEL_OK")
</pallas_src>

<mosaic_0001>
module attributes {stable_mosaic.version = 11 : i64} {
  func.func @em_ssl_sender_kernel(%arg0: i32, %arg1: memref<8x1024xbf16, #tpu.memory_space<vmem>>, %arg2: memref<1024x128xbf16, #tpu.memory_space<vmem>>, %arg3: memref<1x128xf32, #tpu.memory_space<vmem>>, %arg4: memref<128x128xf32, #tpu.memory_space<vmem>>, %arg5: memref<1x128xf32, #tpu.memory_space<vmem>>, %arg6: memref<128x128xf32, #tpu.memory_space<vmem>>, %arg7: memref<8x128xf32, #tpu.memory_space<vmem>>, %arg8: memref<8x128xf32, #tpu.memory_space<vmem>>, %arg9: memref<8x128xf32, #tpu.memory_space<vmem>>) attributes {dimension_semantics = [#tpu.dimension_semantics<parallel>], iteration_bounds = array<i64: 1>, scalar_prefetch = 0 : i64, scratch_operands = 0 : i64, tpu.core_type = #tpu.core_type<tc>, window_params = [{transform_indices = @transform_0, window_bounds = array<i64: 8, 1024>}, {pipeline_mode = #tpu.pipeline_mode<synchronous>, transform_indices = @transform_1, window_bounds = array<i64: 1024, 128>}, {pipeline_mode = #tpu.pipeline_mode<synchronous>, transform_indices = @transform_2, window_bounds = array<i64: 1, 128>}, {pipeline_mode = #tpu.pipeline_mode<synchronous>, transform_indices = @transform_3, window_bounds = array<i64: 128, 128>}, {pipeline_mode = #tpu.pipeline_mode<synchronous>, transform_indices = @transform_4, window_bounds = array<i64: 1, 128>}, {pipeline_mode = #tpu.pipeline_mode<synchronous>, transform_indices = @transform_5, window_bounds = array<i64: 128, 128>}, {transform_indices = @transform_6, window_bounds = array<i64: 8, 128>}, {transform_indices = @transform_7, window_bounds = array<i64: 8, 128>}, {transform_indices = @transform_8, window_bounds = array<i64: 8, 128>}]} {
    %c0 = arith.constant 0 : index
    %c0_0 = arith.constant 0 : index
    %0 = vector.load %arg1[%c0, %c0_0] : memref<8x1024xbf16, #tpu.memory_space<vmem>>, vector<8x1024xbf16>
    %c0_1 = arith.constant 0 : index
    %c0_2 = arith.constant 0 : index
    %1 = vector.load %arg2[%c0_1, %c0_2] : memref<1024x128xbf16, #tpu.memory_space<vmem>>, vector<1024x128xbf16>
    %cst = arith.constant dense<0.000000e+00> : vector<8x128xf32>
    %2 = tpu.matmul %0, %1, %cst {dimension_numbers = #tpu.dot_dimension_numbers<[1], [0], [0], [1], [0, 0, 1, 1], [], []>} : vector<8x1024xbf16>, vector<1024x128xbf16>, vector<8x128xf32> -> vector<8x128xf32>
    %c0_3 = arith.constant 0 : index
    %c0_4 = arith.constant 0 : index
    %3 = vector.load %arg3[%c0_3, %c0_4] : memref<1x128xf32, #tpu.memory_space<vmem>>, vector<1x128xf32>
    %4 = vector.broadcast %3 : vector<1x128xf32> to vector<8x128xf32>
    %5 = arith.addf %2, %4 : vector<8x128xf32>
    %c0_5 = arith.constant 0 : index
    %c0_6 = arith.constant 0 : index
    %6 = vector.load %arg9[%c0_5, %c0_6] : memref<8x128xf32, #tpu.memory_space<vmem>>, vector<8x128xf32>
    tpu.vector_store %arg9[%c0_5, %c0_6], %5 {strides = array<i32>} : memref<8x128xf32, #tpu.memory_space<vmem>>, vector<8x128xf32>,
    %c0_7 = arith.constant 0 : index
    %c0_8 = arith.constant 0 : index
    %7 = vector.load %arg4[%c0_7, %c0_8] : memref<128x128xf32, #tpu.memory_space<vmem>>, vector<128x128xf32>
    %cst_9 = arith.constant dense<0.000000e+00> : vector<8x128xf32>
    %8 = tpu.matmul %5, %7, %cst_9 {dimension_numbers = #tpu.dot_dimension_numbers<[1], [0], [0], [1], [0, 0, 1, 1], [], []>} : vector<8x128xf32>, vector<128x128xf32>, vector<8x128xf32> -> vector<8x128xf32>
    %c0_10 = arith.constant 0 : index
    %c0_11 = arith.constant 0 : index
    %9 = vector.load %arg5[%c0_10, %c0_11] : memref<1x128xf32, #tpu.memory_space<vmem>>, vector<1x128xf32>
    %10 = vector.broadcast %9 : vector<1x128xf32> to vector<8x128xf32>
    %11 = arith.addf %8, %10 : vector<8x128xf32>
    %12 = tpu.iota {dimensions = array<i32: 1>} : vector<8x128xi32>
    %cst_12 = arith.constant dense<0xFF800000> : vector<8xf32>
    %13 = vector.multi_reduction <maximumf>, %11, %cst_12 [1] : vector<8x128xf32> to vector<8xf32>
    %14 = vector.shape_cast %13 : vector<8xf32> to vector<8x1xf32>
    %15 = vector.broadcast %14 : vector<8x1xf32> to vector<8x128xf32>
    %16 = arith.cmpf oeq, %11, %15 : vector<8x128xf32>
    %c128_i32 = arith.constant 128 : i32
    %17 = vector.broadcast %c128_i32 : i32 to vector<8x128xi32>
    %18 = arith.select %16, %12, %17 : vector<8x128xi1>, vector<8x128xi32>
    %cst_13 = arith.constant dense<2147483647> : vector<8xi32>
    %19 = vector.multi_reduction <minsi>, %18, %cst_13 [1] : vector<8x128xi32> to vector<8xi32>
    %20 = vector.shape_cast %19 : vector<8xi32> to vector<8x1xi32>
    %21 = vector.broadcast %20 : vector<8x1xi32> to vector<8x128xi32>
    %22 = arith.cmpi eq, %12, %21 : vector<8x128xi32>
    %23 = arith.extui %22 : vector<8x128xi1> to vector<8x128xi32>
    %24 = arith.sitofp %23 : vector<8x128xi32> to vector<8x128xf32>
    %c0_14 = arith.constant 0 : index
    %c0_15 = arith.constant 0 : index
    %25 = vector.load %arg8[%c0_14, %c0_15] : memref<8x128xf32, #tpu.memory_space<vmem>>, vector<8x128xf32>
    tpu.vector_store %arg8[%c0_14, %c0_15], %24 {strides = array<i32>} : memref<8x128xf32, #tpu.memory_space<vmem>>, vector<8x128xf32>,
    %c0_16 = arith.constant 0 : index
    %c0_17 = arith.constant 0 : index
    %26 = vector.load %arg6[%c0_16, %c0_17] : memref<128x128xf32, #tpu.memory_space<vmem>>, vector<128x128xf32>
    %cst_18 = arith.constant dense<0.000000e+00> : vector<8x128xf32>
    %27 = tpu.matmul %24, %26, %cst_18 {dimension_numbers = #tpu.dot_dimension_numbers<[1], [0], [0], [1], [0, 0, 1, 1], [], []>} : vector<8x128xf32>, vector<128x128xf32>, vector<8x128xf32> -> vector<8x128xf32>
    %c0_19 = arith.constant 0 : index
    %c0_20 = arith.constant 0 : index
    %28 = vector.load %arg7[%c0_19, %c0_20] : memref<8x128xf32, #tpu.memory_space<vmem>>, vector<8x128xf32>
    tpu.vector_store %arg7[%c0_19, %c0_20], %27 {strides = array<i32>} : memref<8x128xf32, #tpu.memory_space<vmem>>, vector<8x128xf32>,
    return
  }
  func.func @transform_0(%arg0: i32) -> (i32, i32) {
    %c0_i32 = arith.constant 0 : i32
    %c0_i32_0 = arith.constant 0 : i32
    return %arg0, %c0_i32 : i32, i32
  }
  func.func @transform_1(%arg0: i32) -> (i32, i32) {
    %c0_i32 = arith.constant 0 : i32
    %c0_i32_0 = arith.constant 0 : i32
    %c0_i32_1 = arith.constant 0 : i32
    return %c0_i32, %c0_i32_0 : i32, i32
  }
  func.func @transform_2(%arg0: i32) -> (i32, i32) {
    %c0_i32 = arith.constant 0 : i32
    %c0_i32_0 = arith.constant 0 : i32
    %c0_i32_1 = arith.constant 0 : i32
    return %c0_i32, %c0_i32_0 : i32, i32
  }
  func.func @transform_3(%arg0: i32) -> (i32, i32) {
    %c0_i32 = arith.constant 0 : i32
    %c0_i32_0 = arith.constant 0 : i32
    %c0_i32_1 = arith.constant 0 : i32
    return %c0_i32, %c0_i32_0 : i32, i32
  }
  func.func @transform_4(%arg0: i32) -> (i32, i32) {
    %c0_i32 = arith.constant 0 : i32
    %c0_i32_0 = arith.constant 0 : i32
    %c0_i32_1 = arith.constant 0 : i32
    return %c0_i32, %c0_i32_0 : i32, i32
  }
  func.func @transform_5(%arg0: i32) -> (i32, i32) {
    %c0_i32 = arith.constant 0 : i32
    %c0_i32_0 = arith.constant 0 : i32
    %c0_i32_1 = arith.constant 0 : i32
    return %c0_i32, %c0_i32_0 : i32, i32
  }
  func.func @transform_6(%arg0: i32) -> (i32, i32) {
    %c0_i32 = arith.constant 0 : i32
    %c0_i32_0 = arith.constant 0 : i32
    return %arg0, %c0_i32 : i32, i32
  }
  func.func @transform_7(%arg0: i32) -> (i32, i32) {
    %c0_i32 = arith.constant 0 : i32
    %c0_i32_0 = arith.constant 0 : i32
    return %arg0, %c0_i32 : i32, i32
  }
  func.func @transform_8(%arg0: i32) -> (i32, i32) {
    %c0_i32 = arith.constant 0 : i32
    %c0_i32_0 = arith.constant 0 : i32
    return %arg0, %c0_i32 : i32, i32
  }
}

</mosaic_0001>

<bundles_post_ra>
// kernel: tpu_custom_call.1
= control target key start
LH: loop header
LB: loop body
LE: loop exit
PB: predicated region body
PF: predicated region fallthrough
CT: control target
= control target key end

     0   :  { %14 = vsyncpa [#allocation3], 0  ;;  %s1778_s0 = inlined_call_operand.hbm [shape: bf16[8,1024], index: 0, kind: input, shape index: {}]   ;;  %s1779_s1 = inlined_call_operand.hbm [shape: bf16[1024,128], index: 1, kind: input, shape index: {}]   ;;  %s1780_s2 = inlined_call_operand.vmem [shape: f32[1,128], index: 2, kind: input, shape index: {}]   ;;  %s1781_s3 = inlined_call_operand.hbm [shape: f32[128,128], index: 3, kind: input, shape index: {}]   ;;  %s1782_s4 = inlined_call_operand.vmem [shape: f32[1,128], index: 4, kind: input, shape index: {}]   ;;  %s1783_s5 = inlined_call_operand.hbm [shape: f32[128,128], index: 5, kind: input, shape index: {}]   ;;  %s1784_s6 = inlined_call_operand.hbm [shape: f32[8,128], index: 6, kind: output, shape index: {0}]   ;;  %s1785_s7 = inlined_call_operand.hbm [shape: f32[8,128], index: 7, kind: output, shape index: {1}]   ;;  %s1786_s8 = inlined_call_operand.hbm [shape: f32[8,128], index: 8, kind: output, shape index: {2}]  }
   0x1   :  { %15 = vsyncpa [#allocation6], 0 }
   0x2   :  { %16 = vsyncpa [#allocation9], 0 }
   0x3   :  { %17 = vsyncpa [#allocation4], 0 }
   0x4   :  { %18 = vsyncpa [#allocation12], 0  ;;  %s1609_s27 = smov [#allocation5]   ;;  %s1445_s9 = scalar_lea.hbm %s1779_s1, 8192 }
   0x5   :  { %s34_s28 = sshll.u32 %s1609_s27, 4  ;;  %p1446_p0 = scmp.ne.s32.totalorder %s1779_s1, %s1445_s9  ;;  %s35_s28 = int_to_ptr.vmem [resolvable:$true] %s34_s28 }
   0x6   :  { %p1449_p1 = scmp.lt.u32.totalorder %s1445_s9, %s1779_s1 }
   0x8   :  { %p1451_p2 = pnand %p1449_p1, %p1446_p0 }
   0xa   :  { %1454 = shalt.err (!%p1451_p2)
}
   0xb   :  { %s1455_s14 = scalar_lea.vmem %s35_s28, 8192  ;;  %p1460_p4 = scmp.lt.s32.totalorder %s35_s28, %s35_s28 }
   0xc   :  { %p1456_p3 = scmp.ne.s32.totalorder %s35_s28, %s1455_s14  ;;  %p1461_p5 = scmp.lt.s32.totalorder %s1455_s14, %s1455_s14 }
   0xe   :  { %p1462_p6 = por %p1461_p5, %p1460_p4 }
  0x10   :  { %p1463_p7 = pnand %p1462_p6, %p1456_p3 }
  0x12   :  { %1466 = shalt.err (!%p1463_p7)
}
  0x13   :  { %s1610_s15 = smov 64   ;;  %s1611_s16 = smov 4  }
  0x14   :  { %40 = dma.hbm_to_vmem [thread:$0]  %s1779_s1, 8192, %s35_s28, [#allocation6], %s1610_s15, %s1610_s15, %s1611_s16  }
  0x15   :  { %s1612_s19 = smov [#allocation2]   ;;  %s1613_s21 = smov [#allocation7]  }
  0x16   :  { %s25_s20 = sshll.u32 %s1612_s19, 4  ;;  %s48_s22 = sshll.u32 %s1613_s21, 4  ;;  %s26_s20 = int_to_ptr.vmem [resolvable:$true] %s25_s20  ;;  %s49_s22 = int_to_ptr.vmem [resolvable:$true] %s48_s22 }
  0x17   :  { %s1467_s25 = scalar_lea.hbm %s1778_s0, 512 }
  0x18   :  { %p1468_p8 = scmp.ne.s32.totalorder %s1778_s0, %s1467_s25  ;;  %p1471_p9 = scmp.lt.u32.totalorder %s1467_s25, %s1778_s0 }
  0x1a   :  { %p1473_p10 = pnand %p1471_p9, %p1468_p8 }
  0x1c   :  { %1476 = shalt.err (!%p1473_p10)
}
  0x1d   :  { %s1477_s1 = scalar_lea.vmem %s26_s20, 512  ;;  %p1482_p12 = scmp.lt.s32.totalorder %s26_s20, %s26_s20 }
  0x1e   :  { %p1478_p11 = scmp.ne.s32.totalorder %s26_s20, %s1477_s1  ;;  %p1483_p13 = scmp.lt.s32.totalorder %s1477_s1, %s1477_s1 }
  0x20   :  { %p1484_p0 = por %p1483_p13, %p1482_p12 }
  0x22   :  { %p1485_p1 = pnand %p1484_p0, %p1478_p11 }
  0x24   :  { %1488 = shalt.err (!%p1485_p1)
}
  0x25   :  { %28 = dma.hbm_to_vmem [thread:$0]  %s1778_s0, 512, %s26_s20, [#allocation3]  }
  0x26   :  { %s1489_s12 = scalar_lea.hbm %s1781_s3, 2048 }
  0x27   :  { %p1490_p2 = scmp.ne.s32.totalorder %s1781_s3, %s1489_s12  ;;  %p1493_p3 = scmp.lt.u32.totalorder %s1489_s12, %s1781_s3 }
  0x29   :  { %p1495_p4 = pnand %p1493_p3, %p1490_p2 }
  0x2b   :  { %1498 = shalt.err (!%p1495_p4)
}
  0x2c   :  { %s1499_s17 = scalar_lea.vmem %s49_s22, 2048  ;;  %p1504_p6 = scmp.lt.s32.totalorder %s49_s22, %s49_s22 }
  0x2d   :  { %p1500_p5 = scmp.ne.s32.totalorder %s49_s22, %s1499_s17  ;;  %p1505_p7 = scmp.lt.s32.totalorder %s1499_s17, %s1499_s17 }
  0x2f   :  { %p1506_p8 = por %p1505_p7, %p1504_p6 }
  0x31   :  { %p1507_p9 = pnand %p1506_p8, %p1500_p5 }
  0x33   :  { %1510 = shalt.err (!%p1507_p9)
}
  0x34   :  { %s1614_s0 = smov 128   ;;  %s1615_s18 = smov 8  }
  0x35   :  { %54 = dma.hbm_to_vmem [thread:$0]  %s1781_s3, 2048, %s49_s22, [#allocation6], %s1614_s0, %s1614_s0, %s1615_s18  }
  0x36   :  { %s1616_s21 = smov [#allocation8]   ;;  %s1511_s26 = scalar_lea.hbm %s1783_s5, 2048 }
  0x37   :  { %s62_s23 = sshll.u32 %s1616_s21, 4  ;;  %p1512_p10 = scmp.ne.s32.totalorder %s1783_s5, %s1511_s26  ;;  %s63_s23 = int_to_ptr.vmem [resolvable:$true] %s62_s23 }
  0x38   :  { %p1515_p11 = scmp.lt.u32.totalorder %s1511_s26, %s1783_s5 }
  0x3a   :  { %p1517_p12 = pnand %p1515_p11, %p1512_p10 }
  0x3c   :  { %1520 = shalt.err (!%p1517_p12)
}
  0x3d   :  { %s1521_s28 = scalar_lea.vmem %s63_s23, 2048  ;;  %p1526_p0 = scmp.lt.s32.totalorder %s63_s23, %s63_s23 }
  0x3e   :  { %p1522_p13 = scmp.ne.s32.totalorder %s63_s23, %s1521_s28  ;;  %p1527_p1 = scmp.lt.s32.totalorder %s1521_s28, %s1521_s28 }
  0x40   :  { %p1528_p2 = por %p1527_p1, %p1526_p0 }
  0x42   :  { %p1529_p3 = pnand %p1528_p2, %p1522_p13 }
  0x44   :  { %1532 = shalt.err (!%p1529_p3)
}
  0x45   :  { %68 = dma.hbm_to_vmem [thread:$0]  %s1783_s5, 2048, %s63_s23, [#allocation9], %s1614_s0, %s1614_s0, %s1615_s18  }
  0x46   :  { %1599 = dma.done.wait [#allocation3], 512  }
  0x47   :  { %1600 = vsyncadd [#allocation3], 4294966784 }
  0x48   :  { %1601 = dma.done.wait [#allocation6], 10240  }
  0x49   :  { %1602 = vsyncadd [#allocation6], 4294957056 }
  0x4a   :  { %1603 = dma.done.wait [#allocation9], 2048  }
  0x4b   :  { %1604 = vsyncadd [#allocation9], 4294965248  ;;  %v1373_v0 = vld [vmem:[#allocation5 + $0x40] sm:$0xff]   ;;  %v1377_v4 = vld [vmem:[#allocation5 + $0x48] sm:$0xff]   ;;  %vm1618_vm0 = vmmov 0  }
  0x4c   :  { %v1374_v1 = vld [vmem:[#allocation5 + $0xc0] sm:$0xff]   ;;  %1118 = vmatprep.subr.bf16.mxu0 %v1373_v0  ;;  %v1378_v5 = vld [vmem:[#allocation5 + $0xc8] sm:$0xff]   ;;  %v1381_v8 = vld [vmem:[#allocation5 + $0x50] sm:$0xff]  }
  0x4d   :  { %v1375_v2 = vld [vmem:[#allocation5] sm:$0xff]   ;;  %1140 = vmatprep.subr.bf16.mxu1 %v1374_v1  ;;  %v1379_v6 = vld [vmem:[#allocation5 + $0x8] sm:$0xff]   ;;  %v1382_v9 = vld [vmem:[#allocation5 + $0xd0] sm:$0xff]  }
  0x4e   :  { %v1376_v3 = vld [vmem:[#allocation5 + $0x80] sm:$0xff]   ;;  %1119 = vmatpush3.bf16.msra.mxu0 %v1375_v2  ;;  %v1380_v7 = vld [vmem:[#allocation5 + $0x88] sm:$0xff]   ;;  %v1383_v10 = vld [vmem:[#allocation5 + $0x10] sm:$0xff]  }
  0x4f   :  { %1141 = vmatpush3.bf16.msra.mxu1 %v1376_v3  ;;  %1120 = vmatprep.subr.bf16.mxu0 %v1377_v4  ;;  %v1384_v11 = vld [vmem:[#allocation5 + $0x90] sm:$0xff]   ;;  %v1385_v12 = vld [vmem:[#allocation5 + $0x58] sm:$0xff]   ;;  %v1389_v16 = vld [vmem:[#allocation5 + $0x60] sm:$0xff]  }
  0x50   :  { %1142 = vmatprep.subr.bf16.mxu1 %v1378_v5  ;;  %v1386_v13 = vld [vmem:[#allocation5 + $0xd8] sm:$0xff]   ;;  %v1390_v17 = vld [vmem:[#allocation5 + $0xe0] sm:$0xff]   ;;  %v1393_v20 = vld [vmem:[#allocation5 + $0x68] sm:$0xff]  }
  0x51   :  { %v1387_v14 = vld [vmem:[#allocation5 + $0x18] sm:$0xff]   ;;  %v1391_v18 = vld [vmem:[#allocation5 + $0x20] sm:$0xff]   ;;  %v1394_v21 = vld [vmem:[#allocation5 + $0xe8] sm:$0xff]  }
  0x52   :  { %1121 = vmatpush3.bf16.msra.mxu0 %v1379_v6  ;;  %v1388_v15 = vld [vmem:[#allocation5 + $0x98] sm:$0xff]   ;;  %v1392_v19 = vld [vmem:[#allocation5 + $0xa0] sm:$0xff]   ;;  %v1395_v22 = vld [vmem:[#allocation5 + $0x28] sm:$0xff]  }
  0x53   :  { %1143 = vmatpush3.bf16.msra.mxu1 %v1380_v7  ;;  %1122 = vmatprep.subr.bf16.mxu0 %v1381_v8  ;;  %v1396_v23 = vld [vmem:[#allocation5 + $0xa8] sm:$0xff]   ;;  %v1397_v24 = vld [vmem:[#allocation5 + $0x70] sm:$0xff]   ;;  %v1401_v28 = vld [vmem:[#allocation5 + $0x78] sm:$0xff]  }
  0x54   :  { %1144 = vmatprep.subr.bf16.mxu1 %v1382_v9  ;;  %v1398_v25 = vld [vmem:[#allocation5 + $0xf0] sm:$0xff]   ;;  %v1402_v29 = vld [vmem:[#allocation5 + $0xf8] sm:$0xff]   ;;  %v82_v32 = vld [vmem:[#allocation2] sm:$0xff] }
  0x55   :  { %v1399_v26 = vld [vmem:[#allocation5 + $0x30] sm:$0xff]   ;;  %v1403_v30 = vld [vmem:[#allocation5 + $0x38] sm:$0xff]   ;;  %v83_v33 = vld [vmem:[#allocation2 + $0x8] sm:$0xff]  ;;  %v1043_v34 = vcombine.low %v82_v32, %v82_v32  ;;  %v1044_v35 = vcombine.high %v82_v32, %v82_v32 }
  0x56   :  { %1123 = vmatpush3.bf16.msra.mxu0 %v1383_v10  ;;  %v1400_v27 = vld [vmem:[#allocation5 + $0xb0] sm:$0xff]   ;;  %v1404_v31 = vld [vmem:[#allocation5 + $0xb8] sm:$0xff]   ;;  %v1045_v36 = vcombine.low %v83_v33, %v83_v33  ;;  %v1046_v37 = vcombine.high %v83_v33, %v83_v33  ;;  %v1409_v38 = vld [vmem:[#allocation5 + $0x140] sm:$0xff]  }
  0x57   :  { %1145 = vmatpush3.bf16.msra.mxu1 %v1384_v11  ;;  %1124 = vmatprep.subr.bf16.mxu0 %v1385_v12  ;;  %v1410_v39 = vld [vmem:[#allocation5 + $0x1c0] sm:$0xff]   ;;  %v1413_v42 = vld [vmem:[#allocation5 + $0x148] sm:$0xff]   ;;  %v1417_v46 = vld [vmem:[#allocation5 + $0x150] sm:$0xff]  }
  0x58   :  { %1146 = vmatprep.subr.bf16.mxu1 %v1386_v13  ;;  %665 = vmatprep.mubr.bf16.mxu0 %v1044_v35  ;;  %v1411_v40 = vld [vmem:[#allocation5 + $0x100] sm:$0xff]   ;;  %v1414_v43 = vld [vmem:[#allocation5 + $0x1c8] sm:$0xff]   ;;  %v1418_v47 = vld [vmem:[#allocation5 + $0x1d0] sm:$0xff]  }
  0x59   :  { %705 = vmatprep.mubr.bf16.mxu1 %v1046_v37  ;;  %v1412_v41 = vld [vmem:[#allocation5 + $0x180] sm:$0xff]   ;;  %v1415_v44 = vld [vmem:[#allocation5 + $0x108] sm:$0xff]   ;;  %v1419_v48 = vld [vmem:[#allocation5 + $0x110] sm:$0xff]   ;;  %v1619_v37 = vmov 0.0  }
  0x5a   :  { %1125 = vmatpush3.bf16.msra.mxu0 %v1387_v14  ;;  %v1416_v45 = vld [vmem:[#allocation5 + $0x188] sm:$0xff]   ;;  %v1420_v49 = vld [vmem:[#allocation5 + $0x190] sm:$0xff]   ;;  %v1421_v50 = vld [vmem:[#allocation5 + $0x158] sm:$0xff]  }
  0x5b   :  { %1147 = vmatpush3.bf16.msra.mxu1 %v1388_v15  ;;  %1126 = vmatprep.subr.bf16.mxu0 %v1389_v16  ;;  %v1422_v51 = vld [vmem:[#allocation5 + $0x1d8] sm:$0xff]   ;;  %v1425_v54 = vld [vmem:[#allocation5 + $0x160] sm:$0xff]   ;;  %v1429_v58 = vld [vmem:[#allocation5 + $0x168] sm:$0xff]   ;;  %v1617_v15 = vmov 0.0|0.0  }
  0x5c   :  { %1148 = vmatprep.subr.bf16.mxu1 %v1390_v17  ;;  %v1423_v52 = vld [vmem:[#allocation5 + $0x118] sm:$0xff]   ;;  %v1426_v55 = vld [vmem:[#allocation5 + $0x1e0] sm:$0xff]   ;;  %v1430_v59 = vld [vmem:[#allocation5 + $0x1e8] sm:$0xff]  }
  0x5d   :  { %v1424_v53 = vld [vmem:[#allocation5 + $0x198] sm:$0xff]   ;;  %v1427_v56 = vld [vmem:[#allocation5 + $0x120] sm:$0xff]   ;;  %v1431_v60 = vld [vmem:[#allocation5 + $0x128] sm:$0xff]  }
  0x5e   :  { %1127 = vmatpush3.bf16.msra.mxu0 %v1391_v18  ;;  %v1428_v57 = vld [vmem:[#allocation5 + $0x1a0] sm:$0xff]   ;;  %v1432_v61 = vld [vmem:[#allocation5 + $0x1a8] sm:$0xff]   ;;  %v1433_v62 = vld [vmem:[#allocation5 + $0x170] sm:$0xff]  }
  0x5f   :  { %1149 = vmatpush3.bf16.msra.mxu1 %v1392_v19  ;;  %1128 = vmatprep.subr.bf16.mxu0 %v1393_v20  ;;  %v1434_v63 = vld [vmem:[#allocation5 + $0x1f0] sm:$0xff]   ;;  %v1437_v2 = vld [vmem:[#allocation5 + $0x178] sm:$0xff]   ;;  %v794_v12 = vld [vmem:[#allocation7] sm:$0xff] }
  0x60   :  { %1150 = vmatprep.subr.bf16.mxu1 %v1394_v21  ;;  %v1435_v0 = vld [vmem:[#allocation5 + $0x130] sm:$0xff]   ;;  %v1438_v3 = vld [vmem:[#allocation5 + $0x1f8] sm:$0xff]   ;;  %v795_v13 = vld [vmem:[#allocation7 + $0x8] sm:$0xff] }
  0x61   :  { %v1436_v1 = vld [vmem:[#allocation5 + $0x1b0] sm:$0xff]   ;;  %v1439_v4 = vld [vmem:[#allocation5 + $0x138] sm:$0xff]   ;;  %v1311_v16 = vpack.c.bf16 %v795_v13, %v794_v12  ;;  %v798_v19 = vld [vmem:[#allocation7 + $0x20] sm:$0xff] }
  0x62   :  { %1129 = vmatpush3.bf16.msra.mxu0 %v1395_v22  ;;  %v1440_v5 = vld [vmem:[#allocation5 + $0x1b8] sm:$0xff]   ;;  %v84_v6 = vld [vmem:[#allocation2 + $0x10] sm:$0xff]  ;;  %v799_v20 = vld [vmem:[#allocation7 + $0x28] sm:$0xff] }
  0x63   :  { %1151 = vmatpush3.bf16.msra.mxu1 %v1396_v23  ;;  %1130 = vmatprep.subr.bf16.mxu0 %v1397_v24  ;;  %v1047_v7 = vcombine.low %v84_v6, %v84_v6  ;;  %v1048_v8 = vcombine.high %v84_v6, %v84_v6  ;;  %v85_v9 = vld [vmem:[#allocation2 + $0x18] sm:$0xff]  ;;  %v796_v14 = vld [vmem:[#allocation7 + $0x10] sm:$0xff]  ;;  %v1317_v21 = vpack.c.bf16 %v799_v20, %v798_v19  ;;  %v807_v32 = vld [vmem:[#allocation7 + $0x68] sm:$0xff] }
  0x64   :  { %1152 = vmatprep.subr.bf16.mxu1 %v1398_v25  ;;  %v1049_v10 = vcombine.low %v85_v9, %v85_v9  ;;  %v1050_v11 = vcombine.high %v85_v9, %v85_v9  ;;  %v797_v17 = vld [vmem:[#allocation7 + $0x18] sm:$0xff]  ;;  %v800_v22 = vld [vmem:[#allocation7 + $0x30] sm:$0xff]  ;;  %v802_v25 = vld [vmem:[#allocation7 + $0x40] sm:$0xff] }
  0x65   :  { %v1314_v18 = vpack.c.bf16 %v797_v17, %v796_v14  ;;  %v801_v23 = vld [vmem:[#allocation7 + $0x38] sm:$0xff]  ;;  %v911_v9 = vld [vmem:[#allocation8] sm:$0xff]  ;;  %v916_v17 = vld [vmem:[#allocation8 + $0x28] sm:$0xff] }
  0x66   :  { %1131 = vmatpush3.bf16.msra.mxu0 %v1399_v26  ;;  %v1320_v24 = vpack.c.bf16 %v801_v23, %v800_v22  ;;  %v803_v26 = vld [vmem:[#allocation7 + $0x48] sm:$0xff]  ;;  %v809_v35 = vld [vmem:[#allocation7 + $0x78] sm:$0xff]  ;;  %v917_v19 = vld [vmem:[#allocation8 + $0x30] sm:$0xff] }
  0x67   :  { %1153 = vmatpush3.bf16.msra.mxu1 %v1400_v27  ;;  %1132 = vmatprep.subr.bf16.mxu0 %v1401_v28  ;;  %v1323_v27 = vpack.c.bf16 %v803_v26, %v802_v25  ;;  %v804_v28 = vld [vmem:[#allocation7 + $0x50] sm:$0xff]  ;;  %v914_v13 = vld [vmem:[#allocation8 + $0x18] sm:$0xff]  ;;  %v919_v22 = vld [vmem:[#allocation8 + $0x40] sm:$0xff] }
  0x68   :  { %1154 = vmatprep.subr.bf16.mxu1 %v1402_v29  ;;  %v805_v29 = vld [vmem:[#allocation7 + $0x58] sm:$0xff]  ;;  %v920_v23 = vld [vmem:[#allocation8 + $0x48] sm:$0xff]  ;;  %v921_v25 = vld [vmem:[#allocation8 + $0x50] sm:$0xff] }
  0x69   :  { %v918_v20 = vld [vmem:[#allocation8 + $0x38] sm:$0xff] }
  0x6a   :  { %1133 = vmatpush3.bf16.msra.mxu0 %v1403_v30  ;;  %v1326_v30 = vpack.c.bf16 %v805_v29, %v804_v28  ;;  %v922_v26 = vld [vmem:[#allocation8 + $0x58] sm:$0xff]  ;;  %v923_v28 = vld [vmem:[#allocation8 + $0x60] sm:$0xff]  ;;  %v924_v29 = vld [vmem:[#allocation8 + $0x68] sm:$0xff] }
  0x6b   :  { %1155 = vmatpush3.bf16.msra.mxu1 %v1404_v31  ;;  %1162 = vmatprep.subr.bf16.mxu0 %v1409_v38  ;;  %v806_v31 = vld [vmem:[#allocation7 + $0x60] sm:$0xff] }
  0x6c   :  { %1184 = vmatprep.subr.bf16.mxu1 %v1410_v39  ;;  %v1329_v33 = vpack.c.bf16 %v807_v32, %v806_v31 }
  0x6d   :  { %666 = vmatmul.mubr.bf16.vlgmr.msra.gmra.mrb[0].mxu0 %v1043_v34  ;;  %v808_v34 = vld [vmem:[#allocation7 + $0x70] sm:$0xff] }
  0x6e   :  { %706 = vmatmul.mubr.bf16.vlgmr.msra.gmra.mrb[0].mxu1 %v1045_v36  ;;  %1163 = vmatpush3.bf16.msra.mxu0 %v1411_v40  ;;  %v1332_v36 = vpack.c.bf16 %v809_v35, %v808_v34  ;;  %v1042_v40 = vld [vmem:[%s1780_s2] ss:$0 sm:$0xff]  ;;  %v925_v35 = vld [vmem:[#allocation8 + $0x70] sm:$0xff] }
  0x6f   :  { %1185 = vmatpush3.bf16.msra.mxu1 %v1412_v41  ;;  %1164 = vmatprep.subr.bf16.mxu0 %v1413_v42 }
  0x70   :  { %1186 = vmatprep.subr.bf16.mxu1 %v1414_v43  ;;  %745 = vmatprep.mubr.bf16.mxu0 %v1048_v8 }
  0x71   :  { %785 = vmatprep.mubr.bf16.mxu1 %v1050_v11  ;;  %v913_v11 = vld [vmem:[#allocation8 + $0x10] sm:$0xff] }
  0x72   :  { %1165 = vmatpush3.bf16.msra.mxu0 %v1415_v44  ;;  %v1338_v14 = vpack.c.bf16 %v914_v13, %v913_v11 }
  0x73   :  { %1187 = vmatpush3.bf16.msra.mxu1 %v1416_v45  ;;  %1166 = vmatprep.subr.bf16.mxu0 %v1417_v46 }
  0x74   :  { %1188 = vmatprep.subr.bf16.mxu1 %v1418_v47 }
  0x76   :  { %1167 = vmatpush3.bf16.msra.mxu0 %v1419_v48 }
  0x77   :  { %1189 = vmatpush3.bf16.msra.mxu1 %v1420_v49  ;;  %1168 = vmatprep.subr.bf16.mxu0 %v1421_v50 }
  0x78   :  { %1190 = vmatprep.subr.bf16.mxu1 %v1422_v51 }
  0x7a   :  { %1169 = vmatpush3.bf16.msra.mxu0 %v1423_v52 }
  0x7b   :  { %1191 = vmatpush3.bf16.msra.mxu1 %v1424_v53  ;;  %1170 = vmatprep.subr.bf16.mxu0 %v1425_v54 }
  0x7c   :  { %1192 = vmatprep.subr.bf16.mxu1 %v1426_v55 }
  0x7e   :  { %1171 = vmatpush3.bf16.msra.mxu0 %v1427_v56 }
  0x7f   :  { %1193 = vmatpush3.bf16.msra.mxu1 %v1428_v57  ;;  %1172 = vmatprep.subr.bf16.mxu0 %v1429_v58 }
  0x80   :  { %1194 = vmatprep.subr.bf16.mxu1 %v1430_v59 }
  0x82   :  { %1173 = vmatpush3.bf16.msra.mxu0 %v1431_v60 }
  0x83   :  { %1195 = vmatpush3.bf16.msra.mxu1 %v1432_v61  ;;  %1174 = vmatprep.subr.bf16.mxu0 %v1433_v62 }
  0x84   :  { %1196 = vmatprep.subr.bf16.mxu1 %v1434_v63  ;;  %v1115_v63 = vld [vmem:[%s1782_s4] ss:$0 sm:$0xff]  ;;  %s1621_s4 = smov [#allocation11]  }
  0x85   :  { %s1014_s11 = sshll.u32 %s1621_s4, 4  ;;  %s1015_s11 = int_to_ptr.vmem [resolvable:$true] %s1014_s11 }
  0x86   :  { %1175 = vmatpush3.bf16.msra.mxu0 %v1435_v0  ;;  %s1533_s12 = scalar_lea.vmem %s1015_s11, 128  ;;  %p1538_p5 = scmp.lt.s32.totalorder %s1015_s11, %s1015_s11 }
  0x87   :  { %1197 = vmatpush3.bf16.msra.mxu1 %v1436_v1  ;;  %1176 = vmatprep.subr.bf16.mxu0 %v1437_v2  ;;  %p1534_p4 = scmp.ne.s32.totalorder %s1015_s11, %s1533_s12  ;;  %p1539_p6 = scmp.lt.s32.totalorder %s1533_s12, %s1533_s12 }
  0x88   :  { %1198 = vmatprep.subr.bf16.mxu1 %v1438_v3  ;;  %v887_v3 = vlaneseq }
  0x89   :  { %p1540_p7 = por %p1539_p6, %p1538_p5 }
  0x8a   :  { %1177 = vmatpush3.bf16.msra.mxu0 %v1439_v4  ;;  %v888_v4 = vand.u32 127, %v887_v3 }
  0x8b   :  { %1199 = vmatpush3.bf16.msra.mxu1 %v1440_v5  ;;  %1310 = vmatprep.subr.bf16.mxu0 %v1617_v15  ;;  %p1541_p8 = pnand %p1540_p7, %p1534_p4 }
  0x8c   :  { %1334 = vmatprep.subr.bf16.mxu1 %v1617_v15 }
  0x8d   :  { %746 = vmatmul.mubr.bf16.vlgmr.msra.gmra.mrb[4].mxu0 %v1047_v7 }
  0x8e   :  { %786 = vmatmul.mubr.bf16.vlgmr.msra.gmra.mrb[4].mxu1 %v1049_v10  ;;  %1312 = vmatpush3.bf16.msra.mxu0 %v1311_v16  ;;  %v912_v10 = vld [vmem:[#allocation8 + $0x8] sm:$0xff]  ;;  %v915_v16 = vld [vmem:[#allocation8 + $0x20] sm:$0xff] }
  0x8f   :  { %1313 = vmatprep.subr.bf16.mxu0 %v1617_v15  ;;  %1272 = vmatprep.mubr.msk.f32.mxu0 %vm1618_vm0, %v1619_v37  ;;  %v1335_v12 = vpack.c.bf16 %v912_v10, %v911_v9 }
  0x90   :  { %1307 = vmatprep.mubr.msk.f32.mxu1 %vm1618_vm0, %v1619_v37 }
  0x91   :  { %1336 = vmatpush3.bf16.msra.mxu1 %v1335_v12 }
  0x92   :  { %1315 = vmatpush3.bf16.msra.mxu0 %v1314_v18  ;;  %1337 = vmatprep.subr.bf16.mxu1 %v1617_v15  ;;  %v1341_v18 = vpack.c.bf16 %v916_v17, %v915_v16 }
  0x93   :  { %1316 = vmatprep.subr.bf16.mxu0 %v1617_v15 }
  0x95   :  { %1339 = vmatpush3.bf16.msra.mxu1 %v1338_v14 }
  0x96   :  { %1318 = vmatpush3.bf16.msra.mxu0 %v1317_v21  ;;  %1340 = vmatprep.subr.bf16.mxu1 %v1617_v15  ;;  %v1344_v21 = vpack.c.bf16 %v918_v20, %v917_v19 }
  0x97   :  { %1319 = vmatprep.subr.bf16.mxu0 %v1617_v15 }
  0x99   :  { %1342 = vmatpush3.bf16.msra.mxu1 %v1341_v18 }
  0x9a   :  { %1321 = vmatpush3.bf16.msra.mxu0 %v1320_v24  ;;  %1343 = vmatprep.subr.bf16.mxu1 %v1617_v15  ;;  %v1347_v24 = vpack.c.bf16 %v920_v23, %v919_v22 }
  0x9b   :  { %1322 = vmatprep.subr.bf16.mxu0 %v1617_v15 }
  0x9d   :  { %1345 = vmatpush3.bf16.msra.mxu1 %v1344_v21 }
  0x9e   :  { %1324 = vmatpush3.bf16.msra.mxu0 %v1323_v27  ;;  %1346 = vmatprep.subr.bf16.mxu1 %v1617_v15  ;;  %v1350_v27 = vpack.c.bf16 %v922_v26, %v921_v25 }
  0x9f   :  { %1325 = vmatprep.subr.bf16.mxu0 %v1617_v15 }
  0xa1   :  { %1348 = vmatpush3.bf16.msra.mxu1 %v1347_v24 }
  0xa2   :  { %1327 = vmatpush3.bf16.msra.mxu0 %v1326_v30  ;;  %1349 = vmatprep.subr.bf16.mxu1 %v1617_v15  ;;  %v1353_v30 = vpack.c.bf16 %v924_v29, %v923_v28 }
  0xa3   :  { %1328 = vmatprep.subr.bf16.mxu0 %v1617_v15 }
  0xa5   :  { %1351 = vmatpush3.bf16.msra.mxu1 %v1350_v27 }
  0xa6   :  { %1330 = vmatpush3.bf16.msra.mxu0 %v1329_v33  ;;  %1352 = vmatprep.subr.bf16.mxu1 %v1617_v15 }
  0xa7   :  { %1331 = vmatprep.subr.bf16.mxu0 %v1617_v15 }
  0xa9   :  { %1354 = vmatpush3.bf16.msra.mxu1 %v1353_v30 }
  0xaa   :  { %1333 = vmatpush3.bf16.msra.mxu0 %v1332_v36  ;;  %1355 = vmatprep.subr.bf16.mxu1 %v1617_v15  ;;  %v926_v36 = vld [vmem:[#allocation8 + $0x78] sm:$0xff] }
 0x140   :  { %v1134_v38 = vpop.f32.mrb[0].mxu0 }
 0x141   :  { %v1156_v39 = vpop.f32.mrb[0].mxu1  ;;  %v1135_v41 = vpop.f32.mrb[1].mxu0 }
 0x142   :  { %v1157_v42 = vpop.f32.mrb[1].mxu1  ;;  %v1136_v43 = vadd.f32 %v1135_v41, %v1134_v38  ;;  %v1137_v45 = vpop.f32.mrb[2].mxu0  ;;  %v1356_v38 = vpack.c.bf16 %v926_v36, %v925_v35 }
 0x143   :  { %v1158_v44 = vadd.f32 %v1157_v42, %v1156_v39  ;;  %v1159_v46 = vpop.f32.mrb[2].mxu1  ;;  %v1138_v47 = vpop.f32.mrb[3].mxu0 }
 0x144   :  { %v1160_v48 = vpop.f32.mrb[3].mxu1  ;;  %v668_v49 = vadd.f32 %v1136_v43, %v1042_v40  ;;  %1357 = vmatpush3.bf16.msra.mxu1 %v1356_v38 }
 0x146   :  { %v708_v50 = vadd.f32 %v1158_v44, %v668_v49  ;;  %v1620_v44 = vmov 1.0  }
 0x160   :  { %v1178_v51 = vpop.f32.mrb[4].mxu0 }
 0x161   :  { %v1200_v52 = vpop.f32.mrb[4].mxu1  ;;  %v1179_v53 = vpop.f32.mrb[5].mxu0 }
 0x162   :  { %v1201_v54 = vpop.f32.mrb[5].mxu1  ;;  %v1180_v55 = vadd.f32 %v1179_v53, %v1178_v51  ;;  %v1181_v57 = vpop.f32.mrb[6].mxu0 }
 0x163   :  { %v1202_v56 = vadd.f32 %v1201_v54, %v1200_v52  ;;  %v1203_v58 = vpop.f32.mrb[6].mxu1  ;;  %v1182_v59 = vpop.f32.mrb[7].mxu0 }
 0x164   :  { %v1204_v60 = vpop.f32.mrb[7].mxu1  ;;  %v748_v61 = vadd.f32 %v1180_v55, %v708_v50 }
 0x166   :  { %v788_v62 = vadd.f32 %v1202_v56, %v748_v61 }
 0x168   :  { %793 = vst [vmem:[#allocation13] sm:$0xff] %v788_v62  ;;  %1273 = vmatmul.mubr.f32.vlgmr.msra.gmra.mrb[8].mxu0 %v788_v62 }
 0x23b   :  { %v883_v0 = vpop.f32.mrb[8].mxu0 }
 0x23c   :  { %v884_v1 = vadd.f32 %v1115_v63, %v883_v0  ;;  %v1274_v2 = vpop.f32.mrb[9].mxu0 }
 0x23e   :  { %889 = vmax.xlane.f32.xlu0 %v884_v1 }
 0x2cb   :  { %v890_v5 = vpop.xlane.xlu0 %889 }
 0x2cc   :  { %vm891_vm1 = vcmp.eq.f32.partialorder %v884_v1, %v890_v5 }
 0x2cd   :  { %v892_v6 = vsel %vm891_vm1, %v888_v4, 128 }
 0x2ce   :  { %v894_v7 = vshra.s32 %v892_v6, 16  ;;  %v893_v31 = vand.u32 65535, %v892_v6 }
 0x2d0   :  { %v896_v8 = vcvt.s32.f32 %v894_v7  ;;  %v895_v33 = vcvt.s32.f32 %v893_v31 }
 0x2d2   :  { %897 = vmin.xlane.f32.xlu0 %v896_v8 }
 0x35f   :  { %v898_v32 = vpop.xlane.xlu0 %897 }
 0x360   :  { %vm899_vm2 = vcmp.eq.f32.partialorder %v896_v8, %v898_v32  ;;  %v904_v39 = vcvt.f32.s32 %v898_v32 }
 0x361   :  { %v900_v34 = vsel %vm899_vm2, %v895_v33, inf }
 0x362   :  { %901 = vmin.xlane.f32.xlu1 %v900_v34  ;;  %v905_v41 = vshll.u32 %v904_v39, 16 }
 0x3ef   :  { %v902_v40 = vpop.xlane.xlu1 %901 }
 0x3f0   :  { %v903_v42 = vcvt.f32.s32 %v902_v40 }
 0x3f2   :  { %v906_v43 = vadd.s32 %v905_v41, %v903_v42 }
 0x3f4   :  { %vm907_vm3 = vcmp.eq.s32.totalorder %v888_v4, %v906_v43 }
 0x3f5   :  { %1308 = vmatmul.mubr.msk.f32.vlgmr.msra.gmra.mrb[8].mxu1 %vm907_vm3, %v1620_v44  ;;  %v1116_v15 = vsel %vm907_vm3, 1.0, %v1619_v37 }
 0x3f6   :  { %910 = vst [vmem:[#allocation11] sm:$0xff] %v1116_v15 }
 0x3f7   :  { %1544 = shalt.err (!%p1541_p8)
}
 0x3f8   :  { %s1545_s15 = scalar_lea.hbm %s1785_s7, 128 }
 0x3f9   :  { %p1546_p9 = scmp.ne.s32.totalorder %s1785_s7, %s1545_s15  ;;  %p1549_p10 = scmp.lt.u32.totalorder %s1545_s15, %s1785_s7 }
 0x3fb   :  { %p1551_p11 = pnand %p1549_p10, %p1546_p9 }
 0x3fd   :  { %1554 = shalt.err (!%p1551_p11)
}
 0x3fe   :  { %1017 = dma.vmem_to_hbm [thread:$0]  %s1015_s11, 128, %s1785_s7, [#allocation12]  }
 0x3ff   :  { %s1622_s21 = smov [#allocation13]  }
 0x400   :  { %s1024_s23 = sshll.u32 %s1622_s21, 4  ;;  %s1025_s23 = int_to_ptr.vmem [resolvable:$true] %s1024_s23 }
 0x401   :  { %s1555_s24 = scalar_lea.vmem %s1025_s23, 128  ;;  %p1560_p13 = scmp.lt.s32.totalorder %s1025_s23, %s1025_s23 }
 0x402   :  { %p1556_p12 = scmp.ne.s32.totalorder %s1025_s23, %s1555_s24  ;;  %p1561_p0 = scmp.lt.s32.totalorder %s1555_s24, %s1555_s24 }
 0x404   :  { %p1562_p1 = por %p1561_p0, %p1560_p13 }
 0x406   :  { %p1563_p2 = pnand %p1562_p1, %p1556_p12 }
 0x408   :  { %1566 = shalt.err (!%p1563_p2)
}
 0x409   :  { %s1567_s27 = scalar_lea.hbm %s1786_s8, 128 }
 0x40a   :  { %p1568_p3 = scmp.ne.s32.totalorder %s1786_s8, %s1567_s27  ;;  %p1571_p4 = scmp.lt.u32.totalorder %s1567_s27, %s1786_s8 }
 0x40c   :  { %p1573_p5 = pnand %p1571_p4, %p1568_p3 }
 0x40e   :  { %1576 = shalt.err (!%p1573_p5)
}
 0x40f   :  { %1027 = dma.vmem_to_hbm [thread:$0]  %s1025_s23, 128, %s1786_s8, [#allocation12]  }
 0x410   :  { %s1623_s22 = smov [#allocation10]  }
 0x411   :  { %s1004_s5 = sshll.u32 %s1623_s22, 4  ;;  %s1005_s5 = int_to_ptr.vmem [resolvable:$true] %s1004_s5 }
 0x412   :  { %s1577_s9 = scalar_lea.vmem %s1005_s5, 128  ;;  %p1582_p7 = scmp.lt.s32.totalorder %s1005_s5, %s1005_s5 }
 0x413   :  { %p1578_p6 = scmp.ne.s32.totalorder %s1005_s5, %s1577_s9  ;;  %p1583_p8 = scmp.lt.s32.totalorder %s1577_s9, %s1577_s9 }
 0x415   :  { %p1584_p9 = por %p1583_p8, %p1582_p7 }
 0x417   :  { %p1585_p10 = pnand %p1584_p9, %p1578_p6 }
 0x4c8   :  { %v993_v37 = vpop.f32.mrb[8].mxu1 }
 0x4c9   :  { %997 = vst [vmem:[#allocation10] sm:$0xff] %v993_v37  ;;  %v1309_v45 = vpop.f32.mrb[9].mxu1 }
 0x4ca   :  { %1588 = shalt.err (!%p1585_p10)
}
 0x4cb   :  { %s1589_s4 = scalar_lea.hbm %s1784_s6, 128 }
 0x4cc   :  { %p1590_p11 = scmp.ne.s32.totalorder %s1784_s6, %s1589_s4  ;;  %p1593_p12 = scmp.lt.u32.totalorder %s1589_s4, %s1784_s6 }
 0x4ce   :  { %p1595_p13 = pnand %p1593_p12, %p1590_p11 }
 0x4d0   :  { %1598 = shalt.err (!%p1595_p13)
}
 0x4d1   :  { %1007 = dma.vmem_to_hbm [thread:$0]  %s1005_s5, 128, %s1784_s6, [#allocation4]  }
 0x4d2   :  { %1605 = dma.done.wait [#allocation4], 128  }
 0x4d3   :  { %1606 = vsyncadd [#allocation4], 4294967168 }
 0x4d4   :  { %1607 = dma.done.wait [#allocation12], 256  }
 0x4d5   :  { %1608 = vsyncadd [#allocation12], 4294967040 }
 0x4d6   :  { %1037 = vsyncpa [#allocation3], 1 }
 0x4d7   :  { %1038 = vsyncpa [#allocation6], 1 }
 0x4d8   :  { %1039 = vsyncpa [#allocation9], 1 }
 0x4d9   :  { %1040 = vsyncpa [#allocation4], 1 }
 0x4da   :  { %1041 = vsyncpa [#allocation12], 1 }

</bundles_post_ra>
